<compile_context>
chip_gen: v7x
topology: tpu7x:2x2x1
jax: 0.10.0
libtpu: 0.0.40
codegen_flags: <defaults>
</compile_context>

<pallas_src>
import jax
import jax.numpy as jnp
from jax.experimental import pallas as pl
from jax.experimental.pallas import tpu as pltpu


def pa_kernel(x_ref, w1_ref, b1_ref, w2_ref, b2_ref, o_ref):
    # x_ref : (C, T)    tile of pixels; channels on sublanes, pixels on lanes
    # w1_ref: (CH, C)   conv1 weight (out_ch, in_ch) in x.dtype, CH = C // 8
    # b1_ref: (CH, 1)   conv1 bias (f32)
    # w2_ref: (CH, 1)   conv2 weight, transposed column (f32)
    # b2_ref: (1, 1)    conv2 bias (SMEM scalar, f32)
    # o_ref : (C, T)
    x = x_ref[...]

    # Conv1x1 #1 (C -> CH): (CH, C) x (C, T) matmul over channels on the MXU.
    # Inputs stay in x.dtype (bf16-native MXU path); accumulate in f32.
    h = jnp.dot(w1_ref[...], x, preferred_element_type=jnp.float32)
    h = jnp.maximum(h + b1_ref[...], 0.0)                     # ReLU, (CH, T) f32

    # Conv1x1 #2 (CH -> 1): tiny projection -> broadcast-mul + sublane reduce
    # (VPU/XLU) instead of a lane-sparse (T, 1) MXU matmul.
    logit = jnp.sum(h * w2_ref[...], axis=0, keepdims=True) + b2_ref[0, 0]
    y = jax.nn.sigmoid(logit)                                 # (1, T), f32

    # Pixel attention: multiply in f32, cast once at the lane-dense store.
    o_ref[...] = (x.astype(jnp.float32) * y).astype(o_ref.dtype)


def _vmem_plan():
    """(tile_budget_bytes, vmem_limit_bytes) derived from the actual chip."""
    default_cap = 64 * 1024 * 1024
    try:
        info = pltpu.get_tpu_info()
        cap = int(getattr(info, "vmem_capacity_bytes", default_cap))
    except Exception:
        cap = default_cap
    # Leave headroom for compiler scratch / semaphores:
    #   v5e/v6e (128 MiB physical) -> limit ~96 MiB; v7x (64 MiB/TC) -> ~48 MiB.
    limit = min(int(cap * 0.75), 96 * 1024 * 1024)
    budget = int(limit * 0.6)
    return budget, limit


def _pick_tile_hw(hw, c, ch, dtype_bytes, n_batch, vmem_budget_bytes):
    """Largest 128-aligned spatial tile fitting the budget (no divisibility req)."""
    # Per spatial lane, per pipeline step:
    #   2x double-buffered input tile + 2x double-buffered output tile
    per_lane = 4 * c * dtype_bytes
    #   + (CH, T) f32 hidden activation
    per_lane += ch * 4
    #   + f32-promoted x tile for the final multiply
    per_lane += c * 4
    #   + f32 logit / y rows
    per_lane += 2 * 4
    cap = max(128, (vmem_budget_bytes // per_lane) // 128 * 128)

    hw_ceil = ((hw + 127) // 128) * 128          # ragged last block is masked
    tile = max(128, min(cap, hw_ceil))

    # Keep enough grid steps for double-buffer overlap and megacore sharding
    # (v7x splits "parallel" axes across 2 TensorCores).
    min_steps = 8
    while tile > 128 and n_batch * pl.cdiv(hw, tile) < min_steps:
        tile = max(128, ((tile // 2) // 128) * 128)
    return tile


def pa_layer(x_nchw, w1, b1, w2, b2):
    """PALayer forward.

    x_nchw: (N, C, H, W)
    w1    : (CH, C)  first 1x1-conv weight (torch (out, in) layout), CH = C//8
    b1    : (CH,)
    w2    : (CH,)    second 1x1-conv weight (1, CH) squeezed
    b2    : ()       scalar bias
    Returns (N, C, H, W) = x * sigmoid(conv(relu(conv(x)))).
    """
    N, C, H, W = x_nchw.shape
    CH = w1.shape[0]
    HW = H * W
    dtype_bytes = jnp.dtype(x_nchw.dtype).itemsize

    # No padding: ragged grid + Pallas masking handle the partial last block.
    x_flat = x_nchw.reshape(N, C, HW)

    vmem_budget, vmem_limit = _vmem_plan()
    tile_hw = _pick_tile_hw(HW, C, CH, dtype_bytes, N, vmem_budget)
    grid = (N, pl.cdiv(HW, tile_hw))

    # Parameters in kernel-friendly shapes (all tiny, resident across the grid).
    w1_k = w1.astype(x_nchw.dtype)                       # (CH, C)  MXU operand
    b1_k = b1.astype(jnp.float32).reshape(CH, 1)         # (CH, 1)
    w2_k = w2.astype(jnp.float32).reshape(CH, 1)         # (CH, 1)
    b2_k = jnp.asarray(b2, jnp.float32).reshape(1, 1)    # (1, 1) -> SMEM

    cost = pl.CostEstimate(
        flops=2 * N * HW * C * CH + 4 * N * HW * CH + N * HW * C,
        transcendentals=N * HW,
        bytes_accessed=2 * N * HW * C * dtype_bytes + (C * CH + 2 * CH + 1) * 4,
    )

    out_flat = pl.pallas_call(
        pa_kernel,
        out_shape=jax.ShapeDtypeStruct((N, C, HW), x_nchw.dtype),
        grid_spec=pltpu.PrefetchScalarGridSpec(
            num_scalar_prefetch=0,
            grid=grid,
            in_specs=[
                pl.BlockSpec((None, C, tile_hw), lambda n, j: (n, 0, j)),  # x
                pl.BlockSpec((CH, C), lambda n, j: (0, 0)),                # w1
                pl.BlockSpec((CH, 1), lambda n, j: (0, 0)),                # b1
                pl.BlockSpec((CH, 1), lambda n, j: (0, 0)),                # w2
                pl.BlockSpec(memory_space=pltpu.MemorySpace.SMEM),         # b2
            ],
            out_specs=pl.BlockSpec((None, C, tile_hw), lambda n, j: (n, 0, j)),
        ),
        compiler_params=pltpu.CompilerParams(
            dimension_semantics=("parallel", "parallel"),
            vmem_limit_bytes=vmem_limit,
        ),
        cost_estimate=cost,
    )(x_flat, w1_k, b1_k, w2_k, b2_k)

    return out_flat.reshape(N, C, H, W)


def _reference(x_nchw, w1, b1, w2, b2):
    # Pure-JAX reference of the PyTorch forward, for a sanity check.
    x = x_nchw.astype(jnp.float32)                                    # NCHW
    h = jnp.einsum("oc,nchw->nohw", w1, x) + b1[None, :, None, None]  # (N,CH,H,W)
    h = jnp.maximum(h, 0.0)
    logit = jnp.einsum("o,nohw->nhw", w2, h)[:, None, :, :] + b2      # (N,1,H,W)
    y = jax.nn.sigmoid(logit)
    return (x * y).astype(x_nchw.dtype)


def _run_case(key, N, C, H, W):
    CH = C // 8
    kx, kw1, kb1, kw2, kb2 = jax.random.split(key, 5)
    x = jax.random.normal(kx, (N, C, H, W), dtype=jnp.float32)
    # Synthetic params in torch Conv2d layout (squeezed 1x1 kernels).
    w1 = jax.random.normal(kw1, (CH, C), dtype=jnp.float32) * 0.1   # conv1 weight
    b1 = jax.random.normal(kb1, (CH,), dtype=jnp.float32) * 0.1     # conv1 bias
    w2 = jax.random.normal(kw2, (CH,), dtype=jnp.float32) * 0.1     # conv2 weight
    b2 = jax.random.normal(kb2, (), dtype=jnp.float32) * 0.1        # conv2 bias

    out = jax.block_until_ready(pa_layer(x, w1, b1, w2, b2))
    ref = _reference(x, w1, b1, w2, b2)
    assert out.shape == (N, C, H, W)
    assert jnp.allclose(out, ref, atol=1e-5, rtol=1e-5), (
        f"mismatch vs reference for shape {(N, C, H, W)}")


if __name__ == "__main__":
    key = jax.random.PRNGKey(0)
    k0, k1 = jax.random.split(key)

    # Small shapes consistent with the module (channel divisible by 8).
    _run_case(k0, N=2, C=16, H=16, W=16)   # lane-aligned spatial size
    _run_case(k1, N=2, C=16, H=15, W=17)   # unaligned H*W -> ragged last block

    print("KERNEL_OK")
</pallas_src>

<mosaic_0001>
module attributes {stable_mosaic.version = 11 : i64} {
  func.func @pa_kernel(%arg0: i32, %arg1: i32, %arg2: memref<1x16x128xf32, #tpu.memory_space<vmem>>, %arg3: memref<2x16xf32, #tpu.memory_space<vmem>>, %arg4: memref<2x1xf32, #tpu.memory_space<vmem>>, %arg5: memref<2x1xf32, #tpu.memory_space<vmem>>, %arg6: memref<1x1xf32, #tpu.memory_space<smem>>, %arg7: memref<1x16x128xf32, #tpu.memory_space<vmem>>) attributes {dimension_semantics = [#tpu.dimension_semantics<parallel>, #tpu.dimension_semantics<parallel>], iteration_bounds = array<i64: 2, 2>, scalar_prefetch = 0 : i64, scratch_operands = 0 : i64, tpu.core_type = #tpu.core_type<tc>, window_params = [{transform_indices = @transform_0, window_bounds = array<i64: 1, 16, 128>}, {pipeline_mode = #tpu.pipeline_mode<synchronous>, transform_indices = @transform_1, window_bounds = array<i64: 2, 16>}, {pipeline_mode = #tpu.pipeline_mode<synchronous>, transform_indices = @transform_2, window_bounds = array<i64: 2, 1>}, {pipeline_mode = #tpu.pipeline_mode<synchronous>, transform_indices = @transform_3, window_bounds = array<i64: 2, 1>}, {transform_indices = @transform_4, window_bounds = array<i64: 1, 1>}, {transform_indices = @transform_5, window_bounds = array<i64: 1, 16, 128>}]} {
    %c0 = arith.constant 0 : index
    %c0_0 = arith.constant 0 : index
    %c0_1 = arith.constant 0 : index
    %0 = vector.load %arg2[%c0, %c0_0, %c0_1] : memref<1x16x128xf32, #tpu.memory_space<vmem>>, vector<1x16x128xf32>
    %1 = vector.shape_cast %0 : vector<1x16x128xf32> to vector<16x128xf32>
    %c0_2 = arith.constant 0 : index
    %c0_3 = arith.constant 0 : index
    %2 = vector.load %arg3[%c0_2, %c0_3] : memref<2x16xf32, #tpu.memory_space<vmem>>, vector<2x16xf32>
    %cst = arith.constant dense<0.000000e+00> : vector<2x128xf32>
    %3 = tpu.matmul %2, %1, %cst {dimension_numbers = #tpu.dot_dimension_numbers<[1], [0], [0], [1], [0, 0, 1, 1], [], []>} : vector<2x16xf32>, vector<16x128xf32>, vector<2x128xf32> -> vector<2x128xf32>
    %c0_4 = arith.constant 0 : index
    %c0_5 = arith.constant 0 : index
    %4 = vector.load %arg4[%c0_4, %c0_5] : memref<2x1xf32, #tpu.memory_space<vmem>>, vector<2x1xf32>
    %5 = vector.broadcast %4 : vector<2x1xf32> to vector<2x128xf32>
    %6 = arith.addf %3, %5 : vector<2x128xf32>
    %cst_6 = arith.constant 0.000000e+00 : f32
    %7 = vector.broadcast %cst_6 : f32 to vector<2x128xf32>
    %8 = arith.maximumf %6, %7 : vector<2x128xf32>
    %c0_7 = arith.constant 0 : index
    %c0_8 = arith.constant 0 : index
    %9 = vector.load %arg5[%c0_7, %c0_8] : memref<2x1xf32, #tpu.memory_space<vmem>>, vector<2x1xf32>
    %10 = vector.broadcast %9 : vector<2x1xf32> to vector<2x128xf32>
    %11 = arith.mulf %8, %10 : vector<2x128xf32>
    %cst_9 = arith.constant dense<0.000000e+00> : vector<128xf32>
    %12 = vector.multi_reduction <add>, %11, %cst_9 [0] : vector<2x128xf32> to vector<128xf32>
    %13 = vector.shape_cast %12 : vector<128xf32> to vector<1x128xf32>
    %c0_10 = arith.constant 0 : index
    %c0_11 = arith.constant 0 : index
    %14 = memref.load %arg6[%c0_10, %c0_11] : memref<1x1xf32, #tpu.memory_space<smem>>
    %15 = vector.broadcast %14 : f32 to vector<1x128xf32>
    %16 = arith.addf %13, %15 : vector<1x128xf32>
    %17 = arith.negf %16 : vector<1x128xf32>
    %18 = math.exp %17 : vector<1x128xf32>
    %cst_12 = arith.constant 1.000000e+00 : f32
    %19 = vector.broadcast %cst_12 : f32 to vector<1x128xf32>
    %20 = arith.addf %19, %18 : vector<1x128xf32>
    %21 = arith.divf %19, %20 : vector<1x128xf32>
    %22 = vector.broadcast %21 : vector<1x128xf32> to vector<16x128xf32>
    %23 = arith.mulf %1, %22 : vector<16x128xf32>
    %c0_13 = arith.constant 0 : index
    %c0_14 = arith.constant 0 : index
    %c0_15 = arith.constant 0 : index
    %24 = vector.load %arg7[%c0_13, %c0_14, %c0_15] : memref<1x16x128xf32, #tpu.memory_space<vmem>>, vector<1x16x128xf32>
    %25 = vector.shape_cast %24 : vector<1x16x128xf32> to vector<16x128xf32>
    %26 = vector.shape_cast %23 : vector<16x128xf32> to vector<1x16x128xf32>
    tpu.vector_store %arg7[%c0_13, %c0_14, %c0_15], %26 {strides = array<i32>} : memref<1x16x128xf32, #tpu.memory_space<vmem>>, vector<1x16x128xf32>,
    return
  }
  func.func @transform_0(%arg0: i32, %arg1: i32) -> (i32, i32, i32) {
    %c0_i32 = arith.constant 0 : i32
    %c0_i32_0 = arith.constant 0 : i32
    return %arg0, %c0_i32, %arg1 : i32, i32, i32
  }
  func.func @transform_1(%arg0: i32, %arg1: i32) -> (i32, i32) {
    %c0_i32 = arith.constant 0 : i32
    %c0_i32_0 = arith.constant 0 : i32
    %c0_i32_1 = arith.constant 0 : i32
    return %c0_i32, %c0_i32_0 : i32, i32
  }
  func.func @transform_2(%arg0: i32, %arg1: i32) -> (i32, i32) {
    %c0_i32 = arith.constant 0 : i32
    %c0_i32_0 = arith.constant 0 : i32
    %c0_i32_1 = arith.constant 0 : i32
    return %c0_i32, %c0_i32_0 : i32, i32
  }
  func.func @transform_3(%arg0: i32, %arg1: i32) -> (i32, i32) {
    %c0_i32 = arith.constant 0 : i32
    %c0_i32_0 = arith.constant 0 : i32
    %c0_i32_1 = arith.constant 0 : i32
    return %c0_i32, %c0_i32_0 : i32, i32
  }
  func.func @transform_4(%arg0: i32, %arg1: i32) -> (i32, i32) {
    %c0_i32 = arith.constant 0 : i32
    %c0_i32_0 = arith.constant 0 : i32
    %c0_i32_1 = arith.constant 0 : i32
    return %c0_i32, %c0_i32_0 : i32, i32
  }
  func.func @transform_5(%arg0: i32, %arg1: i32) -> (i32, i32, i32) {
    %c0_i32 = arith.constant 0 : i32
    %c0_i32_0 = arith.constant 0 : i32
    return %arg0, %c0_i32, %arg1 : i32, i32, i32
  }
}

</mosaic_0001>

<bundles_post_ra>
// kernel: tpu_custom_call.1
= control target key start
LH: loop header
LB: loop body
LE: loop exit
PB: predicated region body
PF: predicated region fallthrough
CT: control target
= control target key end

     0   :  { %s982_s0 = inlined_call_operand.hbm [shape: f32[2,16,256], index: 0, kind: input, shape index: {}]   ;;  %s983_s1 = inlined_call_operand.vmem [shape: f32[2,16], index: 1, kind: input, shape index: {}]   ;;  %s984_s2 = inlined_call_operand.vmem [shape: f32[2,1], index: 2, kind: input, shape index: {}]   ;;  %s985_s3 = inlined_call_operand.vmem [shape: f32[2,1], index: 3, kind: input, shape index: {}]   ;;  %s986_s4 = inlined_call_operand.<no memory space> [shape: f32[1,1], index: 4, kind: input, shape index: {}]   ;;  %s987_s5 = inlined_call_operand.hbm [shape: f32[2,16,256], index: 5, kind: output, shape index: {}]  }
   0x1   :  { %10 = sst [smem:[#allocation2]] %s986_s4 }
   0x2   :  { %11 = vsyncpa [#allocation4], 0 }
   0x3   :  { %13 = vsyncpa [#allocation4 + $0x1], 0 }
   0x4   :  { %14 = vsyncpa [#allocation5], 0 }
   0x5   :  { %16 = vsyncpa [#allocation5 + $0x1], 0  ;;  %s774_s20 = smov 0   ;;  %s776_s21 = smov 0  }
   0x6   :  { %s778_s22 = smov 0   ;;  %s780_s23 = smov 0  }
   0x7   :  { %s782_s24 = smov 0   ;;  %s784_s25 = smov 0  }
   0x8   :  { %s786_s26 = smov 0   ;;  %s788_s27 = smov 0  }
   0x9 LB: > { %s476_s4 = sadd.s32 4294967295, %s727_s27   ;;  %s477_s28 = sadd.s32 4294967294, %s727_s27   ;;  %s727_s27 = sphi %s788_s27, %s22_s27   ;;  %s723_s26 = sphi %s786_s26, %s1008_s26   ;;  %s719_s25 = sphi %s784_s25, %s1007_s25   ;;  %s715_s24 = sphi %s782_s24, %s1006_s24   ;;  %s711_s23 = sphi %s780_s23, %s1005_s23   ;;  %s707_s22 = sphi %s778_s22, %s1004_s22   ;;  %s703_s21 = sphi %s776_s21, %s1003_s21   ;;  %s699_s20 = sphi %s774_s20, %s1002_s20  }
   0xa   : > { %s31_s29 = sadd.s32 1, %s719_s25  ;;  %s34_s30 = sadd.s32 1, %s723_s26 }
   0xb   : > { %p32_p0 = scmp.ge.s32.totalorder %s31_s29, 2  ;;  %s43_s6 = sadd.s32 1, %s707_s22 }
   0xc   : > { %p50_p1 = scmp.ne.s32.totalorder %s707_s22, %s703_s21  ;;  %p51_p2 = scmp.eq.s32.totalorder %s727_s27, 0 }
   0xd   : > { %s1010_s29 = smov (%p32_p0, %s31_s29), 0  ;;  %s1012_s30 = smov (!%p32_p0, %s34_s30), %s723_s26 }
   0xe   : > { %991 = sst [smem:[#allocation9_spill]] %s1010_s29  ;;  %s39_s7 = ssub.s32 %s719_s25, %s1010_s29 }
   0xf   : > { %p827_p3 = por %p51_p2, %p50_p1  ;;  %p36_p4 = scmp.ge.s32.totalorder %s1012_s30, 2 }
  0x10   : > { %p56_p5 = scmp.ne.s32.totalorder %s703_s21, %s699_s20  ;;  %p57_p6 = scmp.eq.s32.totalorder %s476_s4, 0 }
  0x11   : > { %p166_p7 = scmp.eq.s32.totalorder %s476_s4, 3  ;;  %s1014_s30 = smov (%p36_p4, %s1012_s30), 0 }
  0x12   : > { %993 = sst [smem:[#allocation10_spill]] %s1014_s30  ;;  %p835_p8 = por %p57_p6, %p56_p5 }
  0x13   : > { %p839_p9 = por %p166_p7, %p50_p1  ;;  %s38_s11 = ssub.s32 %s723_s26, %s1014_s30 }
  0x14   : > { %p172_p10 = scmp.eq.s32.totalorder %s477_s28, 3  ;;  %s40_s12 = sor.u32 %s39_s7, %s38_s11 }
  0x15   : > { %s995_s10 = scalar_select %p839_p9, 1, 0 }
  0x16   : > { %p41_p11 = scmp.eq.s32.totalorder %s40_s12, 0  ;;  %p845_p12 = por %p172_p10, %p56_p5 }
  0x17   : > { %p518_p13 = scmp.lt.s32.totalorder %s727_s27, 4  ;;  %s204_s14 = sand.u32 1, %s707_s22  }
  0x18   : > { %s996_s13 = scalar_select %p845_p12, 1, 0 }
  0x19   : > { %s852_s15 = scalar_select %p41_p11, %s707_s22, %s43_s6  }
  0x1a   : > { %s480_s16 = sshll.u32 %s204_s14, 4  ;;  %s481_s17 = sshll.u32 %s723_s26, 2 }
  0x1b   : > { %s213_s18 = sadd.s32 %s719_s25, %s481_s17  ;;  %s208_s19 = scalar_lea.vmem [#allocation3], %s480_s16 }
  0x1c   : > { %s216_s4 = sshll.u32 %s208_s19, 4  ;;  %s482_s29 = sshll.u32 %s213_s18, 7  ;;  %s856_s4 = int_to_ptr.vmem [resolvable:$true] %s216_s4 }
  0x1d   : > { %s861_s7 = scalar_lea.hbm %s982_s0, %s482_s29  ;;  %p865_p0 = pnand %p518_p13, %p827_p3 }
  0x1e   : > { %s869_s11 = scalar_lea.sflag [#allocation4], %s204_s14  ;;  %s599_s12 = scalar_lea.hbm %s861_s7, 256 }
  0x1f   : > { %p600_p1 = scmp.ne.s32.totalorder %s861_s7, %s599_s12  ;;  %p601_p2 = pneg %p865_p0 }
  0x20   : > { %s604_s8 = scalar_lea.hbm %s982_s0, 1024  ;;  %p605_p3 = scmp.lt.u32.totalorder %s861_s7, %s982_s0 }
  0x21   : > { %p602_p4 = pnand %p601_p2, %p600_p1  ;;  %p606_p6 = scmp.lt.u32.totalorder %s604_s8, %s599_s12 }
  0x22   : > { %p608_p10 = scmp.lt.u32.totalorder %s599_s12, %s861_s7 }
  0x23   : > { %p603_p5 = pneg %p602_p4  ;;  %p607_p7 = por %p606_p6, %p605_p3 }
  0x25   : > { %p609_p11 = por %p608_p10, %p607_p7 }
  0x27   : > { %p610_p13 = pnand %p609_p11, %p603_p5 }
  0x29   : > { %613 = shalt.err (!%p610_p13)
}
  0x2a   : > { %s614_s14 = scalar_lea.vmem %s856_s4, 256  ;;  %s729_s18 = smov [#allocation3]  }
  0x2b   : > { %p615_p1 = scmp.ne.s32.totalorder %s856_s4, %s614_s14  ;;  %s619_s19 = sshll.u32 %s729_s18, 4  ;;  %s620_s19 = int_to_ptr.vmem [resolvable:$false] %s619_s19 }
  0x2c   : > { %s621_s28 = scalar_lea.vmem %s620_s19, 512  ;;  %p622_p9 = scmp.lt.s32.totalorder %s856_s4, %s620_s19 }
  0x2d   : > { %p617_p4 = pnand %p615_p1, %p601_p2  ;;  %p623_p3 = scmp.lt.s32.totalorder %s621_s28, %s614_s14 }
  0x2f   : > { %p618_p12 = pneg %p617_p4  ;;  %p624_p6 = por %p623_p3, %p622_p9 }
  0x31   : > { %p625_p7 = pnand %p624_p6, %p618_p12 }
  0x33   : > { %628 = shalt.err (!%p625_p7)
}
  0x34   : > { %s730_s12 = smov 256   ;;  %s731_s29 = smov 128  }
  0x35   : > { %s732_s30 = smov 8   ;;  %p483_p2 = scmp.ge.s32.totalorder %s727_s27, 1 }
  0x36   : > { %513 = dma.hbm_to_vmem [thread:$0]  (!%p865_p0), %s861_s7, 256, %s856_s4, %s869_s11, %s730_s12, %s731_s29, %s732_s30  }
  0x37   : > { %p224_p5 = scmp.lt.s32.totalorder %s727_s27, 5 }
  0x39   : > { %p225_p10 = pnand %p483_p2, %p224_p5 }
  0x3a   : > { %s900_s8 = sand.u32 (!%p225_p10), 1, %s703_s21  }
  0x3b   : > { %228 = sbr.rel (%p225_p10) target bundleno = 351 (0x15f), region = 40  ;;  %s484_s16 = sshll.u32 (!%p225_p10), %s900_s8, 4 }
  0x3c   : > { %s231_s17 = scalar_lea.sflag (!%p225_p10), [#allocation4], %s900_s8  ;;  %s234_s14 = scalar_lea.vmem (!%p225_p10), [#allocation3], %s484_s16 }
  0x42   : > { %690 = dma.done.wait (%p835_p8), %s231_s17, 256  }
  0x43   : > { %692 = vsyncadd (%p835_p8), %s231_s17, 4294967040  ;;  %v733_v0 = vmov 0.0|0.0   ;;  %vm734_vm0 = vmmov 0   ;;  %v735_v1 = vmov 0.0   ;;  %v736_v2 = vmov 0   ;;  %v261_v3 = vld [vmem:[%s234_s14] sm:$0xff] }
  0x44   : > { %503 = vmatprep.subr.bf16.mxu0 %v733_v0  ;;  %500 = vmatprep.mubr.msk.f32.mxu0 %vm734_vm0, %v735_v1  ;;  %v262_v4 = vld [vmem:[%s234_s14 + $0x8] sm:$0xff]  ;;  %v264_v6 = vld [vmem:[%s984_s2] sm:$0x3]  ;;  %vm270_vm1 = vcmask 130048   ;;  %vm352_vm2 = vcmask 1041408   ;;  %s360_s19 = sld [smem:[#allocation2]] }
  0x45   : > { %594 = vset.pattern.permute.xlu0 %v736_v2  ;;  %v504_v5 = vpack.c.bf16 %v262_v4, %v261_v3  ;;  %v263_v7 = vld [vmem:[%s983_s1] sm:$0x3]  ;;  %s489_s28 = sshll.u32 %s715_s24, 2  ;;  %s260_s30 = scalar_lea.vmem [#allocation6], %s484_s16 }
  0x46   : > { %267 = vperm.xlu0 %594, %v264_v6   ;;  %v345_v8 = vld [vmem:[%s985_s3] sm:$0x3]  ;;  %s385_s12 = sadd.s32 %s711_s23, %s489_s28  ;;  %s388_s17 = sshll.u32 %s260_s30, 4  ;;  %s928_s17 = int_to_ptr.vmem [resolvable:$true] %s388_s17 }
  0x47   : > { %505 = vmatpush3.bf16.msra.mxu0 %v504_v5  ;;  %s490_s29 = sshll.u32 %s385_s12, 7  ;;  %s374_s23 = scalar_lea.sflag [#allocation5], %s900_s8 }
  0x48   : > { %s926_s7 = scalar_lea.hbm %s987_s5, %s490_s29  ;;  %s629_s24 = scalar_lea.vmem %s928_s17, 256 }
  0x49   : > { %p630_p8 = scmp.ne.s32.totalorder %s928_s17, %s629_s24  ;;  %p998_p9 = scmp.ne.s32.totalorder %s995_s10, 0 }
  0x4a   : > { %501 = vmatmul.mubr.msk.f32.vlgmr.msra.gmra.mrb[0].mxu0 %vm270_vm1, %v263_v7  ;;  %348 = vperm.xlu0 %594, %v345_v8   ;;  %v361_v22 = vstv %s360_s19  ;;  %s737_s16 = smov [#allocation6]  }
  0x4b   : > { %p631_p12 = pnand %p630_p8, %p998_p9  ;;  %s633_s6 = sshll.u32 %s737_s16, 4  ;;  %s634_s6 = int_to_ptr.vmem [resolvable:$false] %s633_s6 }
  0x4c   : > { %s635_s11 = scalar_lea.vmem %s634_s6, 512  ;;  %p636_p11 = scmp.lt.s32.totalorder %s928_s17, %s634_s6 }
  0x4d   : > { %p632_p0 = pneg %p631_p12  ;;  %p637_p13 = scmp.lt.s32.totalorder %s635_s11, %s629_s24 }
  0x4f   : > { %p638_p1 = por %p637_p13, %p636_p11 }
  0x51   : > { %p639_p4 = pnand %p638_p1, %p632_p0 }
  0xc5   : > { %v268_v9 = vpop.permute.xlu0 %267 }
  0xc9   : > { %v349_v14 = vpop.permute.xlu0 %348 }
 0x11d   : > { %v340_v10 = vpop.f32.mrb[0].mxu0 }
 0x11e   : > { %v341_v11 = vadd.f32 %v340_v10, %v268_v9  ;;  %v502_v12 = vpop.f32.mrb[1].mxu0 }
 0x120   : > { %v344_v13 = vmax.f32 %v341_v11, 0.0 }
 0x122   : > { %v351_v15 = vmul.f32 %v349_v14, %v344_v13 }
 0x124   : > { %v353_v16 = vsel %vm352_vm2, %v351_v15, 0.0 }
 0x125   : > { %v354_v17 = vrot.slane %v353_v16, 4 }
 0x127   : > { %v355_v18 = vadd.f32 %v354_v17, %v353_v16 }
 0x129   : > { %v356_v19 = vrot.slane %v355_v18, 2 }
 0x12b   : > { %v357_v20 = vadd.f32 %v356_v19, %v355_v18 }
 0x12d   : > { %v358_v21 = vrot.slane %v357_v20, 1 }
 0x12f   : > { %v359_v23 = vadd.f32 %v358_v21, %v357_v20 }
 0x131   : > { %v362_v24 = vadd.f32 %v361_v22, %v359_v23 }
 0x133   : > { %v487_v25 = vmul.f32 -1.442695, %v362_v24 }
 0x135   : > { %595 = vpow2.f32 %v487_v25 }
 0x13f   : > { %v596_v26 = vpop.eup %595 }
 0x140   : > { %v366_v27 = vadd.f32 1.0, %v596_v26 }
 0x142   : > { %597 = vrcp.f32 %v366_v27 }
 0x14c   : > { %v598_v28 = vpop.eup %597 }
 0x14d   : > { %v369_v29 = vmul.f32 %v598_v28, %v261_v3  ;;  %v370_v30 = vmul.f32 %v598_v28, %v262_v4 }
 0x14f   : > { %371 = vst [vmem:[%s260_s30] sm:$0xff] %v369_v29  ;;  %372 = vst [vmem:[%s260_s30 + $0x8] sm:$0xff] %v370_v30 }
 0x150   : > { %642 = shalt.err (!%p639_p4)
}
 0x151   : > { %s643_s9 = scalar_lea.hbm %s926_s7, 256  ;;  %s647_s28 = scalar_lea.hbm %s987_s5, 1024 }
 0x152   : > { %p644_p3 = scmp.ne.s32.totalorder %s926_s7, %s643_s9  ;;  %p648_p2 = scmp.lt.u32.totalorder %s926_s7, %s987_s5 }
 0x153   : > { %p649_p5 = scmp.lt.u32.totalorder %s647_s28, %s643_s9  ;;  %p651_p8 = scmp.lt.u32.totalorder %s643_s9, %s926_s7 }
 0x154   : > { %p645_p6 = pnand %p644_p3, %p998_p9 }
 0x155   : > { %p650_p10 = por %p649_p5, %p648_p2 }
 0x156   : > { %p646_p7 = pneg %p645_p6 }
 0x157   : > { %p652_p12 = por %p651_p8, %p650_p10 }
 0x159   : > { %p653_p0 = pnand %p652_p12, %p646_p7 }
 0x15b   : > { %656 = shalt.err (!%p653_p0)
}
 0x15c   : > { %s738_s30 = smov 128   ;;  %s739_s14 = smov 256  }
 0x15d   : > { %s740_s4 = smov 8  }
 0x15e   : > { %508 = dma.vmem_to_hbm [thread:$0]  (%p998_p9), %s928_s17, 256, %s926_s7, %s374_s23, %s738_s30, %s739_s14, %s740_s4  }
 0x15f PF: > { %p519_p11 = scmp.ge.s32.totalorder %s727_s27, 2  ;;  %s403_s24 = sand.u32 1, %s699_s20  }
 0x160   : > { %p999_p13 = scmp.ne.s32.totalorder %s996_s13, 0  ;;  %s404_s16 = scalar_lea.sflag [#allocation5], %s403_s24 }
 0x162   : > { %p515_p1 = pnand %p519_p11, %p999_p13 }
 0x164   : > { %694 = dma.done.wait (!%p515_p1), %s404_s16, 256  }
 0x165   : > { %696 = vsyncadd (!%p515_p1), %s404_s16, 4294967040  ;;  %s22_s27 = sadd.s32 1, %s727_s27   ;;  %s1000_s10 = sld [smem:[#allocation9_spill]] }
 0x166   : > { %p19_p4 = scmp.ge.s32.totalorder %s22_s27, 6   ;;  %s1001_s8 = sld [smem:[#allocation10_spill]] }
 0x167   : > { %s1002_s20 = smov %s703_s21  ;;  %s1003_s21 = smov %s707_s22 }
 0x168   : > { %s1004_s22 = smov %s852_s15  ;;  %s1005_s23 = smov %s719_s25 }
 0x169   : > { %s1006_s24 = smov %s723_s26  ;;  %21 = sbr.rel (!%p19_p4) target bundleno = 9 (0x9), region = 85 }
 0x16b   : > { %s1007_s25 = smov %s1000_s10 }
 0x16c   : > { %s1008_s26 = smov %s1001_s8 }
 0x170   :  { %409 = vsyncpa [#allocation4], 1 }
 0x171   :  { %411 = vsyncpa [#allocation4 + $0x1], 1 }
 0x172   :  { %412 = vsyncpa [#allocation5], 1 }
 0x173   :  { %414 = vsyncpa [#allocation5 + $0x1], 1 }

</bundles_post_ra>
